<compile_context>
chip_gen: v5e
topology: v5e:2x2
jax: 0.10.0
libtpu: 0.0.40
codegen_flags: <defaults>
</compile_context>

<pallas_src>
import math
import jax
import jax.numpy as jnp
from jax import lax
from jax.experimental import pallas as pl
from jax.experimental.pallas import tpu as pltpu

HIDDEN = 512  # fixed by the module definition (fc1: dim->512, fc2: 512->dim)


def _round_up(x, m):
    return ((x + m - 1) // m) * m


def _mlp_kernel(x_ref, w1_ref, b1_ref, w2_ref, b2_ref, o_ref):
    # x_ref: (tm, dim_p) f32, w1_ref: (dim_p, 512) bf16, b1_ref: (1, 512) f32,
    # w2_ref: (512, dim_p) bf16, b2_ref: (1, dim_p) f32, o_ref: (tm, dim_p) f32
    x = x_ref[...].astype(w1_ref.dtype)  # bf16 MXU inputs, f32 accumulation
    h = jnp.dot(x, w1_ref[...], preferred_element_type=jnp.float32) + b1_ref[...]
    # exact (erf-based) GELU in f32, matching torch.nn.GELU() default
    h = 0.5 * h * (1.0 + lax.erf(h * (1.0 / math.sqrt(2.0))))
    # TODO(synk): Dropout(0.1) is identity in eval mode; training-mode dropout not implemented.
    o = jnp.dot(h.astype(w2_ref.dtype), w2_ref[...],
                preferred_element_type=jnp.float32) + b2_ref[...]
    o_ref[...] = o.astype(o_ref.dtype)


def mlp_pallas(x, w1, b1, w2, b2, *, tm=256, use_bf16=True):
    """x: [..., dim] float32. w1: [dim, 512], b1: [1, 512], w2: [512, dim], b2: [1, dim].
    Returns same shape as x."""
    orig_shape = x.shape
    dim = orig_shape[-1]
    x2 = x.reshape(-1, dim)
    M = x2.shape[0]

    # Lane-dense feature dimension (multiple of 128).
    dim_p = _round_up(max(dim, 128), 128)
    # Row tile: multiple of 8 sublanes, clamped so tiny inputs don't over-pad.
    tm_eff = min(_round_up(tm, 8), _round_up(M, 8))
    M_p = _round_up(M, tm_eff)
    grid = M_p // tm_eff

    mm_dtype = jnp.bfloat16 if use_bf16 else jnp.float32

    # Zero padding keeps the math exact: padded x cols x zero w1 rows contribute 0,
    # padded w2 cols / b2 entries produce 0 in the padded output lanes (sliced off below).
    x_p = jnp.pad(x2, ((0, M_p - M), (0, dim_p - dim)))
    w1_p = jnp.pad(w1, ((0, dim_p - dim), (0, 0))).astype(mm_dtype)
    w2_p = jnp.pad(w2, ((0, 0), (0, dim_p - dim))).astype(mm_dtype)
    b1_p = b1.astype(jnp.float32)
    b2_p = jnp.pad(b2, ((0, 0), (0, dim_p - dim))).astype(jnp.float32)

    weight_bytes = (w1_p.size + w2_p.size) * w1_p.dtype.itemsize \
                   + (b1_p.size + b2_p.size) * 4
    cost = pl.CostEstimate(
        flops=4 * M_p * dim_p * HIDDEN,           # two matmuls
        transcendentals=M_p * HIDDEN,             # erf in GELU
        bytes_accessed=2 * M_p * dim_p * 4 + weight_bytes,
    )

    out = pl.pallas_call(
        _mlp_kernel,
        out_shape=jax.ShapeDtypeStruct((M_p, dim_p), x.dtype),
        grid_spec=pltpu.PrefetchScalarGridSpec(
            num_scalar_prefetch=0,
            grid=(grid,),
            in_specs=[
                pl.BlockSpec((tm_eff, dim_p), lambda i: (i, 0)),   # x row tile
                pl.BlockSpec((dim_p, HIDDEN), lambda i: (0, 0)),   # W1 (resident)
                pl.BlockSpec((1, HIDDEN), lambda i: (0, 0)),       # b1
                pl.BlockSpec((HIDDEN, dim_p), lambda i: (0, 0)),   # W2 (resident)
                pl.BlockSpec((1, dim_p), lambda i: (0, 0)),        # b2
            ],
            out_specs=pl.BlockSpec((tm_eff, dim_p), lambda i: (i, 0)),
        ),
        compiler_params=pltpu.CompilerParams(
            dimension_semantics=("parallel",),
        ),
        cost_estimate=cost,
    )(x_p, w1_p, b1_p, w2_p, b2_p)

    return out[:M, :dim].reshape(orig_shape)


def init_mlp_params(key, dim):
    """Deterministic init matching the module's _init_weights (xavier_uniform + tiny normal bias).
    Weights are stored transposed relative to torch Linear (i.e. [in, out]) so the
    kernel computes x @ W + b, which equals x @ weight.T + bias in torch."""
    k1, k2, k3, k4 = jax.random.split(key, 4)
    bound1 = math.sqrt(6.0 / (dim + HIDDEN))
    bound2 = math.sqrt(6.0 / (HIDDEN + dim))
    w1 = jax.random.uniform(k1, (dim, HIDDEN), jnp.float32, -bound1, bound1)
    w2 = jax.random.uniform(k2, (HIDDEN, dim), jnp.float32, -bound2, bound2)
    b1 = 1e-6 * jax.random.normal(k3, (1, HIDDEN), jnp.float32)
    b2 = 1e-6 * jax.random.normal(k4, (1, dim), jnp.float32)
    return w1, b1, w2, b2


def mlp_reference(x, w1, b1, w2, b2, mm_dtype=jnp.bfloat16):
    """Reference in the same precision regime as the kernel (bf16 MXU inputs, f32 accum)."""
    h = jnp.dot(x.astype(mm_dtype), w1.astype(mm_dtype),
                preferred_element_type=jnp.float32) + b1
    h = 0.5 * h * (1.0 + lax.erf(h / math.sqrt(2.0)))
    return jnp.dot(h.astype(mm_dtype), w2.astype(mm_dtype),
                   preferred_element_type=jnp.float32) + b2


if __name__ == "__main__":
    key = jax.random.PRNGKey(0)
    kx, kp = jax.random.split(key)

    batch, seq, dim = 2, 8, 32
    x = jax.random.normal(kx, (batch, seq, dim), jnp.float32)
    w1, b1, w2, b2 = init_mlp_params(kp, dim)

    out = mlp_pallas(x, w1, b1, w2, b2)
    out = jax.block_until_ready(out)

    ref = mlp_reference(x.reshape(-1, dim), w1, b1, w2, b2).reshape(x.shape)
    assert out.shape == x.shape
    assert jnp.allclose(out, ref, atol=5e-3, rtol=5e-3), "mismatch vs reference"

    print("KERNEL_OK")
</pallas_src>

<mosaic_0001>
module attributes {stable_mosaic.version = 11 : i64} {
  func.func @_mlp_kernel(%arg0: i32, %arg1: memref<16x128xf32, #tpu.memory_space<vmem>>, %arg2: memref<128x512xbf16, #tpu.memory_space<vmem>>, %arg3: memref<1x512xf32, #tpu.memory_space<vmem>>, %arg4: memref<512x128xbf16, #tpu.memory_space<vmem>>, %arg5: memref<1x128xf32, #tpu.memory_space<vmem>>, %arg6: memref<16x128xf32, #tpu.memory_space<vmem>>) attributes {dimension_semantics = [#tpu.dimension_semantics<parallel>], iteration_bounds = array<i64: 1>, scalar_prefetch = 0 : i64, scratch_operands = 0 : i64, tpu.core_type = #tpu.core_type<tc>, window_params = [{transform_indices = @transform_0, window_bounds = array<i64: 16, 128>}, {pipeline_mode = #tpu.pipeline_mode<synchronous>, transform_indices = @transform_1, window_bounds = array<i64: 128, 512>}, {pipeline_mode = #tpu.pipeline_mode<synchronous>, transform_indices = @transform_2, window_bounds = array<i64: 1, 512>}, {pipeline_mode = #tpu.pipeline_mode<synchronous>, transform_indices = @transform_3, window_bounds = array<i64: 512, 128>}, {pipeline_mode = #tpu.pipeline_mode<synchronous>, transform_indices = @transform_4, window_bounds = array<i64: 1, 128>}, {transform_indices = @transform_5, window_bounds = array<i64: 16, 128>}]} {
    %c0 = arith.constant 0 : index
    %c0_0 = arith.constant 0 : index
    %0 = vector.load %arg1[%c0, %c0_0] : memref<16x128xf32, #tpu.memory_space<vmem>>, vector<16x128xf32>
    %1 = arith.truncf %0 : vector<16x128xf32> to vector<16x128xbf16>
    %c0_1 = arith.constant 0 : index
    %c0_2 = arith.constant 0 : index
    %2 = vector.load %arg2[%c0_1, %c0_2] : memref<128x512xbf16, #tpu.memory_space<vmem>>, vector<128x512xbf16>
    %cst = arith.constant dense<0.000000e+00> : vector<16x512xf32>
    %3 = tpu.matmul %1, %2, %cst {dimension_numbers = #tpu.dot_dimension_numbers<[1], [0], [0], [1], [0, 0, 1, 1], [], []>} : vector<16x128xbf16>, vector<128x512xbf16>, vector<16x512xf32> -> vector<16x512xf32>
    %c0_3 = arith.constant 0 : index
    %c0_4 = arith.constant 0 : index
    %4 = vector.load %arg3[%c0_3, %c0_4] : memref<1x512xf32, #tpu.memory_space<vmem>>, vector<1x512xf32>
    %5 = vector.broadcast %4 : vector<1x512xf32> to vector<16x512xf32>
    %6 = arith.addf %3, %5 : vector<16x512xf32>
    %cst_5 = arith.constant 5.000000e-01 : f32
    %7 = vector.broadcast %cst_5 : f32 to vector<16x512xf32>
    %8 = arith.mulf %7, %6 : vector<16x512xf32>
    %cst_6 = arith.constant 0.707106769 : f32
    %9 = vector.broadcast %cst_6 : f32 to vector<16x512xf32>
    %10 = arith.mulf %6, %9 : vector<16x512xf32>
    %11 = math.erf %10 : vector<16x512xf32>
    %cst_7 = arith.constant 1.000000e+00 : f32
    %12 = vector.broadcast %cst_7 : f32 to vector<16x512xf32>
    %13 = arith.addf %12, %11 : vector<16x512xf32>
    %14 = arith.mulf %8, %13 : vector<16x512xf32>
    %15 = arith.truncf %14 : vector<16x512xf32> to vector<16x512xbf16>
    %c0_8 = arith.constant 0 : index
    %c0_9 = arith.constant 0 : index
    %16 = vector.load %arg4[%c0_8, %c0_9] : memref<512x128xbf16, #tpu.memory_space<vmem>>, vector<512x128xbf16>
    %cst_10 = arith.constant dense<0.000000e+00> : vector<16x128xf32>
    %17 = tpu.matmul %15, %16, %cst_10 {dimension_numbers = #tpu.dot_dimension_numbers<[1], [0], [0], [1], [0, 0, 1, 1], [], []>} : vector<16x512xbf16>, vector<512x128xbf16>, vector<16x128xf32> -> vector<16x128xf32>
    %c0_11 = arith.constant 0 : index
    %c0_12 = arith.constant 0 : index
    %18 = vector.load %arg5[%c0_11, %c0_12] : memref<1x128xf32, #tpu.memory_space<vmem>>, vector<1x128xf32>
    %19 = vector.broadcast %18 : vector<1x128xf32> to vector<16x128xf32>
    %20 = arith.addf %17, %19 : vector<16x128xf32>
    %c0_13 = arith.constant 0 : index
    %c0_14 = arith.constant 0 : index
    %21 = vector.load %arg6[%c0_13, %c0_14] : memref<16x128xf32, #tpu.memory_space<vmem>>, vector<16x128xf32>
    tpu.vector_store %arg6[%c0_13, %c0_14], %20 {strides = array<i32>} : memref<16x128xf32, #tpu.memory_space<vmem>>, vector<16x128xf32>,
    return
  }
  func.func @transform_0(%arg0: i32) -> (i32, i32) {
    %c0_i32 = arith.constant 0 : i32
    %c0_i32_0 = arith.constant 0 : i32
    return %arg0, %c0_i32 : i32, i32
  }
  func.func @transform_1(%arg0: i32) -> (i32, i32) {
    %c0_i32 = arith.constant 0 : i32
    %c0_i32_0 = arith.constant 0 : i32
    %c0_i32_1 = arith.constant 0 : i32
    return %c0_i32, %c0_i32_0 : i32, i32
  }
  func.func @transform_2(%arg0: i32) -> (i32, i32) {
    %c0_i32 = arith.constant 0 : i32
    %c0_i32_0 = arith.constant 0 : i32
    %c0_i32_1 = arith.constant 0 : i32
    return %c0_i32, %c0_i32_0 : i32, i32
  }
  func.func @transform_3(%arg0: i32) -> (i32, i32) {
    %c0_i32 = arith.constant 0 : i32
    %c0_i32_0 = arith.constant 0 : i32
    %c0_i32_1 = arith.constant 0 : i32
    return %c0_i32, %c0_i32_0 : i32, i32
  }
  func.func @transform_4(%arg0: i32) -> (i32, i32) {
    %c0_i32 = arith.constant 0 : i32
    %c0_i32_0 = arith.constant 0 : i32
    %c0_i32_1 = arith.constant 0 : i32
    return %c0_i32, %c0_i32_0 : i32, i32
  }
  func.func @transform_5(%arg0: i32) -> (i32, i32) {
    %c0_i32 = arith.constant 0 : i32
    %c0_i32_0 = arith.constant 0 : i32
    return %arg0, %c0_i32 : i32, i32
  }
}

</mosaic_0001>

<bundles_post_ra>
// kernel: tpu_custom_call.1
= control target key start
LH: loop header
LB: loop body
LE: loop exit
PB: predicated region body
PF: predicated region fallthrough
CT: control target
= control target key end

     0   :  { %10 = vsyncpa [#allocation3], 0  ;;  %s1944_s0 = inlined_call_operand.hbm [shape: f32[16,128], index: 0, kind: input, shape index: {}]   ;;  %s1945_s1 = inlined_call_operand.hbm [shape: bf16[128,512], index: 1, kind: input, shape index: {}]   ;;  %s1946_s2 = inlined_call_operand.hbm [shape: f32[1,512], index: 2, kind: input, shape index: {}]   ;;  %s1947_s3 = inlined_call_operand.hbm [shape: bf16[512,128], index: 3, kind: input, shape index: {}]   ;;  %s1948_s4 = inlined_call_operand.vmem [shape: f32[1,128], index: 4, kind: input, shape index: {}]   ;;  %s1949_s5 = inlined_call_operand.hbm [shape: f32[16,128], index: 5, kind: output, shape index: {}]  }
   0x1   :  { %11 = vsyncpa [#allocation6], 0 }
   0x2   :  { %12 = vsyncpa [#allocation9], 0  ;;  %s31_s20 = sshll.u32 %s1945_s1, 4  ;;  %s32_s20 = int_to_ptr.hbm [resolvable:$true] %s31_s20 }
   0x3   :  { %13 = vsyncpa [#allocation4], 0  ;;  %s1522_s21 = smov [#allocation5]   ;;  %s18_s25 = sshll.u32 %s1944_s0, 4  ;;  %s19_s25 = int_to_ptr.hbm [resolvable:$true] %s18_s25 }
   0x4   :  { %s33_s22 = sshll.u32 %s1522_s21, 4  ;;  %s1523_s26 = smov 256   ;;  %s34_s22 = int_to_ptr.vmem [resolvable:$true] %s33_s22 }
   0x5   :  { %s1524_s27 = smov 16   ;;  %s1525_s28 = smov [#allocation2]  }
   0x6   :  { %39 = dma.hbm_to_vmem [thread:$0]  %s32_s20, 4096, %s34_s22, [#allocation6], %s1523_s26, %s1523_s26, %s1524_s27  }
   0x7   :  { %s20_s29 = sshll.u32 %s1525_s28, 4  ;;  %s1526_s30 = smov 128   ;;  %s21_s29 = int_to_ptr.vmem [resolvable:$true] %s20_s29 }
   0x8   :  { %s1527_s6 = smov 8   ;;  %s45_s8 = sshll.u32 %s1946_s2, 4  ;;  %s46_s8 = int_to_ptr.hbm [resolvable:$true] %s45_s8 }
   0x9   :  { %26 = dma.hbm_to_vmem [thread:$0]  %s19_s25, 256, %s21_s29, [#allocation3], %s1526_s30, %s1526_s30, %s1527_s6  }
   0xa   :  { %s1528_s9 = smov [#allocation7]   ;;  %s55_s12 = sshll.u32 %s1947_s3, 4  ;;  %s56_s12 = int_to_ptr.hbm [resolvable:$true] %s55_s12 }
   0xb   :  { %s47_s0 = sshll.u32 %s1528_s9, 4  ;;  %s1529_s13 = smov [#allocation8]   ;;  %s48_s0 = int_to_ptr.vmem [resolvable:$true] %s47_s0 }
   0xc   :  { %50 = dma.hbm_to_vmem [thread:$0]  %s46_s8, 64, %s48_s0, [#allocation6]  }
   0xd   :  { %s57_s14 = sshll.u32 %s1529_s13, 4  ;;  %s1530_s15 = smov 64   ;;  %s58_s14 = int_to_ptr.vmem [resolvable:$true] %s57_s14 }
   0xe   :  { %s1531_s16 = smov 4  }
   0xf   :  { %63 = dma.hbm_to_vmem [thread:$0]  %s56_s12, 4096, %s58_s14, [#allocation9], %s1530_s15, %s1530_s15, %s1531_s16  }
  0x10   :  { %1514 = dma.done.wait [#allocation3], 256  }
  0x11   :  { %1515 = vsyncadd [#allocation3], 4294967040 }
  0x12   :  { %1516 = dma.done.wait [#allocation6], 4160  }
  0x13   :  { %1517 = vsyncadd [#allocation6], 4294963136 }
  0x14   :  { %1518 = dma.done.wait [#allocation9], 4096  }
  0x15   :  { %1519 = vsyncadd [#allocation9], 4294963200  ;;  %v1152_v0 = vld [vmem:[#allocation5 + $0xe0] sm:$0xf]  ;;  %v1332_v1 = vld [vmem:[#allocation5 + $0xec] sm:$0xf0] }
  0x16   :  { %v1330_v2 = vld [vmem:[#allocation5 + $0xe4] sm:$0xf]  ;;  %v1153_v3 = vor.u32 %v1332_v1, %v1152_v0  ;;  %v1154_v4 = vld [vmem:[#allocation5 + $0xf0] sm:$0xf0]  ;;  %v1160_v5 = vld [vmem:[#allocation5 + $0xe8] sm:$0xf] }
  0x17   :  { %v1333_v6 = vld [vmem:[#allocation5 + $0xf4] sm:$0xf0]  ;;  %v1157_v7 = vor.u32 %v1330_v2, %v1154_v4  ;;  %v1331_v9 = vld [vmem:[#allocation5 + $0xec] sm:$0xf]  ;;  %v1162_v10 = vld [vmem:[#allocation5 + $0xf8] sm:$0xf0] }
  0x18   :  { %v1161_v8 = vor.u32 %v1333_v6, %v1160_v5  ;;  %v1136_v11 = vld [vmem:[#allocation5 + $0xc0] sm:$0xf]  ;;  %287 = vmatpush.bf16.msra.mxu0 %v1153_v3  ;;  %v1165_v12 = vor.u32 %v1331_v9, %v1162_v10  ;;  %v1328_v13 = vld [vmem:[#allocation5 + $0xcc] sm:$0xf0]  ;;  %v1326_v14 = vld [vmem:[#allocation5 + $0xc4] sm:$0xf] }
  0x19   :  { %v1138_v15 = vld [vmem:[#allocation5 + $0xd0] sm:$0xf0]  ;;  %301 = vmatpush.bf16.msra.mxu1 %v1157_v7  ;;  %v1137_v16 = vor.u32 %v1328_v13, %v1136_v11  ;;  %v1144_v18 = vld [vmem:[#allocation5 + $0xc8] sm:$0xf]  ;;  %v1329_v19 = vld [vmem:[#allocation5 + $0xd4] sm:$0xf0] }
  0x1a   :  { %315 = vmatpush.bf16.msra.mxu2 %v1161_v8  ;;  %v1141_v17 = vor.u32 %v1326_v14, %v1138_v15  ;;  %v1327_v20 = vld [vmem:[#allocation5 + $0xcc] sm:$0xf]  ;;  %329 = vmatpush.bf16.msra.mxu3 %v1165_v12  ;;  %v1145_v21 = vor.u32 %v1329_v19, %v1144_v18  ;;  %v1146_v22 = vld [vmem:[#allocation5 + $0xd8] sm:$0xf0]  ;;  %v1120_v23 = vld [vmem:[#allocation5 + $0xa0] sm:$0xf] }
  0x1b   :  { %v1324_v24 = vld [vmem:[#allocation5 + $0xac] sm:$0xf0]  ;;  %v1149_v25 = vor.u32 %v1327_v20, %v1146_v22  ;;  %v1322_v26 = vld [vmem:[#allocation5 + $0xa4] sm:$0xf]  ;;  %v1122_v27 = vld [vmem:[#allocation5 + $0xb0] sm:$0xf0] }
  0x1c   :  { %v1128_v28 = vld [vmem:[#allocation5 + $0xa8] sm:$0xf]  ;;  %288 = vmatpush.bf16.msra.mxu0 %v1137_v16  ;;  %v1121_v29 = vor.u32 %v1324_v24, %v1120_v23  ;;  %v1325_v30 = vld [vmem:[#allocation5 + $0xb4] sm:$0xf0]  ;;  %v1323_v31 = vld [vmem:[#allocation5 + $0xac] sm:$0xf]  ;;  %v1125_v33 = vor.u32 %v1322_v26, %v1122_v27 }
  0x1d   :  { %v1130_v32 = vld [vmem:[#allocation5 + $0xb8] sm:$0xf0]  ;;  %302 = vmatpush.bf16.msra.mxu1 %v1141_v17  ;;  %v1129_v34 = vor.u32 %v1325_v30, %v1128_v28  ;;  %v1104_v35 = vld [vmem:[#allocation5 + $0x80] sm:$0xf]  ;;  %v1320_v36 = vld [vmem:[#allocation5 + $0x8c] sm:$0xf0] }
  0x1e   :  { %316 = vmatpush.bf16.msra.mxu2 %v1145_v21  ;;  %v1318_v37 = vld [vmem:[#allocation5 + $0x84] sm:$0xf]  ;;  %330 = vmatpush.bf16.msra.mxu3 %v1149_v25  ;;  %v1133_v38 = vor.u32 %v1323_v31, %v1130_v32  ;;  %v1106_v39 = vld [vmem:[#allocation5 + $0x90] sm:$0xf0]  ;;  %v1112_v40 = vld [vmem:[#allocation5 + $0x88] sm:$0xf]  ;;  %v1105_v44 = vor.u32 %v1320_v36, %v1104_v35 }
  0x1f   :  { %v1321_v41 = vld [vmem:[#allocation5 + $0x94] sm:$0xf0]  ;;  %v1319_v42 = vld [vmem:[#allocation5 + $0x8c] sm:$0xf]  ;;  %v1114_v43 = vld [vmem:[#allocation5 + $0x98] sm:$0xf0]  ;;  %v1109_v45 = vor.u32 %v1318_v37, %v1106_v39 }
  0x20   :  { %289 = vmatpush.bf16.msra.mxu0 %v1121_v29  ;;  %v1113_v46 = vor.u32 %v1321_v41, %v1112_v40  ;;  %v1088_v47 = vld [vmem:[#allocation5 + $0x60] sm:$0xf]  ;;  %v1316_v48 = vld [vmem:[#allocation5 + $0x6c] sm:$0xf0]  ;;  %v1314_v49 = vld [vmem:[#allocation5 + $0x64] sm:$0xf]  ;;  %v1117_v50 = vor.u32 %v1319_v42, %v1114_v43 }
  0x21   :  { %303 = vmatpush.bf16.msra.mxu1 %v1125_v33  ;;  %v1090_v51 = vld [vmem:[#allocation5 + $0x70] sm:$0xf0]  ;;  %v1096_v52 = vld [vmem:[#allocation5 + $0x68] sm:$0xf]  ;;  %v1317_v53 = vld [vmem:[#allocation5 + $0x74] sm:$0xf0]  ;;  %v1089_v56 = vor.u32 %v1316_v48, %v1088_v47 }
  0x22   :  { %317 = vmatpush.bf16.msra.mxu2 %v1129_v34  ;;  %331 = vmatpush.bf16.msra.mxu3 %v1133_v38  ;;  %v1315_v54 = vld [vmem:[#allocation5 + $0x6c] sm:$0xf]  ;;  %v1098_v55 = vld [vmem:[#allocation5 + $0x78] sm:$0xf0]  ;;  %v1093_v57 = vor.u32 %v1314_v49, %v1090_v51  ;;  %v1097_v58 = vor.u32 %v1317_v53, %v1096_v52  ;;  %v1072_v59 = vld [vmem:[#allocation5 + $0x40] sm:$0xf] }
  0x23   :  { %v1312_v60 = vld [vmem:[#allocation5 + $0x4c] sm:$0xf0]  ;;  %v1310_v61 = vld [vmem:[#allocation5 + $0x44] sm:$0xf]  ;;  %v1101_v62 = vor.u32 %v1315_v54, %v1098_v55  ;;  %v1074_v63 = vld [vmem:[#allocation5 + $0x50] sm:$0xf0] }
  0x24   :  { %290 = vmatpush.bf16.msra.mxu0 %v1105_v44  ;;  %v1080_v0 = vld [vmem:[#allocation5 + $0x48] sm:$0xf]  ;;  %v1313_v1 = vld [vmem:[#allocation5 + $0x54] sm:$0xf0]  ;;  %v1311_v2 = vld [vmem:[#allocation5 + $0x4c] sm:$0xf]  ;;  %v1073_v4 = vor.u32 %v1312_v60, %v1072_v59  ;;  %v1077_v5 = vor.u32 %v1310_v61, %v1074_v63 }
  0x25   :  { %304 = vmatpush.bf16.msra.mxu1 %v1109_v45  ;;  %v1082_v3 = vld [vmem:[#allocation5 + $0x58] sm:$0xf0]  ;;  %v1081_v6 = vor.u32 %v1313_v1, %v1080_v0  ;;  %v1056_v7 = vld [vmem:[#allocation5 + $0x20] sm:$0xf]  ;;  %v1308_v8 = vld [vmem:[#allocation5 + $0x2c] sm:$0xf0] }
  0x26   :  { %318 = vmatpush.bf16.msra.mxu2 %v1113_v46  ;;  %332 = vmatpush.bf16.msra.mxu3 %v1117_v50  ;;  %v1306_v9 = vld [vmem:[#allocation5 + $0x24] sm:$0xf]  ;;  %v1085_v10 = vor.u32 %v1311_v2, %v1082_v3  ;;  %v1058_v11 = vld [vmem:[#allocation5 + $0x30] sm:$0xf0]  ;;  %v1064_v12 = vld [vmem:[#allocation5 + $0x28] sm:$0xf]  ;;  %v1057_v16 = vor.u32 %v1308_v8, %v1056_v7 }
  0x27   :  { %v1309_v13 = vld [vmem:[#allocation5 + $0x34] sm:$0xf0]  ;;  %v1307_v14 = vld [vmem:[#allocation5 + $0x2c] sm:$0xf]  ;;  %v1066_v15 = vld [vmem:[#allocation5 + $0x38] sm:$0xf0]  ;;  %v1061_v17 = vor.u32 %v1306_v9, %v1058_v11 }
  0x28   :  { %291 = vmatpush.bf16.msra.mxu0 %v1089_v56  ;;  %v1065_v18 = vor.u32 %v1309_v13, %v1064_v12  ;;  %v1040_v19 = vld [vmem:[#allocation5] sm:$0xf]  ;;  %v1304_v20 = vld [vmem:[#allocation5 + $0xc] sm:$0xf0]  ;;  %v1302_v21 = vld [vmem:[#allocation5 + $0x4] sm:$0xf]  ;;  %v1069_v22 = vor.u32 %v1307_v14, %v1066_v15 }
  0x29   :  { %305 = vmatpush.bf16.msra.mxu1 %v1093_v57  ;;  %v1042_v23 = vld [vmem:[#allocation5 + $0x10] sm:$0xf0]  ;;  %v1048_v24 = vld [vmem:[#allocation5 + $0x8] sm:$0xf]  ;;  %v1305_v25 = vld [vmem:[#allocation5 + $0x14] sm:$0xf0]  ;;  %v1041_v28 = vor.u32 %v1304_v20, %v1040_v19 }
  0x2a   :  { %319 = vmatpush.bf16.msra.mxu2 %v1097_v58  ;;  %333 = vmatpush.bf16.msra.mxu3 %v1101_v62  ;;  %v1303_v26 = vld [vmem:[#allocation5 + $0xc] sm:$0xf]  ;;  %v1050_v27 = vld [vmem:[#allocation5 + $0x18] sm:$0xf0]  ;;  %v82_v29 = vld [vmem:[#allocation2] sm:$0xff]  ;;  %v1045_v31 = vor.u32 %v1302_v21, %v1042_v23  ;;  %v1049_v32 = vor.u32 %v1305_v25, %v1048_v24  ;;  %s1532_s17 = smov [#allocation10]  }
  0x2b   :  { %v83_v30 = vld [vmem:[#allocation2 + $0x8] sm:$0xff]  ;;  %v1053_v33 = vor.u32 %v1303_v26, %v1050_v27  ;;  %v1578_v35 = vld [vmem:[#allocation7] sm:$0xf]  ;;  %s1021_s18 = sshll.u32 %s1532_s17, 4  ;;  %s1022_s18 = int_to_ptr.vmem [resolvable:$true] %s1021_s18 }
  0x2c   :  { %292 = vmatpush.bf16.msra.mxu0 %v1073_v4  ;;  %v84_v34 = vpack.c.bf16 %v83_v30, %v82_v29  ;;  %v119_v36 = vperm.slane %v1578_v35, 0  ;;  %v120_v37 = vperm.slane %v1578_v35, 1  ;;  %v121_v44 = vperm.slane %v1578_v35, 2 }
  0x2d   :  { %306 = vmatpush.bf16.msra.mxu1 %v1077_v5  ;;  %v122_v54 = vperm.slane %v1578_v35, 3 }
  0x2e   :  { %320 = vmatpush.bf16.msra.mxu2 %v1081_v6  ;;  %334 = vmatpush.bf16.msra.mxu3 %v1085_v10 }
  0x30   :  { %293 = vmatpush.bf16.msra.mxu0 %v1057_v16 }
  0x31   :  { %307 = vmatpush.bf16.msra.mxu1 %v1061_v17 }
  0x32   :  { %321 = vmatpush.bf16.msra.mxu2 %v1065_v18  ;;  %335 = vmatpush.bf16.msra.mxu3 %v1069_v22 }
  0x34   :  { %294 = vmatpush.bf16.msra.mxu0 %v1041_v28 }
  0x35   :  { %308 = vmatpush.bf16.msra.mxu1 %v1045_v31 }
  0x36   :  { %322 = vmatpush.bf16.msra.mxu2 %v1049_v32  ;;  %336 = vmatpush.bf16.msra.mxu3 %v1053_v33 }
  0x37   :  { %295 = vmatmul.bf16.vlgmr.msra.gmra.mxu0 %v84_v34 }
  0x38   :  { %309 = vmatmul.bf16.vlgmr.msra.gmra.mxu1 %v84_v34 }
  0x39   :  { %323 = vmatmul.bf16.vlgmr.msra.gmra.mxu2 %v84_v34  ;;  %337 = vmatmul.bf16.vlgmr.msra.gmra.mxu3 %v84_v34 }
  0xb4   :  { %v296_v38 = vpop.f32.mrf.mxu0 }
  0xb5   :  { %v1582_v39 = vadd.f32 %v296_v38, %v119_v36  ;;  %v310_v40 = vpop.f32.mrf.mxu1 }
  0xb6   :  { %v1586_v41 = vadd.f32 %v310_v40, %v120_v37 }
  0xb7   :  { %v1589_v42 = vmul.f32 0.70710677, %v1582_v39 }
  0xb8   :  { %v1592_v43 = vmul.f32 0.70710677, %v1586_v41 }
  0xb9   :  { %v359_v45 = vmul.f32 %v1589_v42, %v1589_v42 }
  0xba   :  { %v399_v46 = vmul.f32 %v1592_v43, %v1592_v43 }
  0xbb   :  { %v1599_v47 = vmin.f32 %v359_v45, 16.0 }
  0xbc   :  { %v324_v48 = vpop.f32.mrf.mxu2  ;;  %v1601_v49 = vmin.f32 %v399_v46, 16.0  ;;  %v338_v57 = vpop.f32.mrf.mxu3 }
  0xbd   :  { %v1605_v50 = vadd.f32 %v324_v48, %v121_v44  ;;  %v372_v51 = vmul.f32 3.8918573e-05, %v1599_v47  ;;  %v361_v52 = vmul.f32 2.1237322e-06, %v1599_v47  ;;  %v1621_v0 = vadd.f32 %v338_v57, %v122_v54  ;;  %v298_v1 = vpop.f32.mrf.mxu0  ;;  %v312_v29 = vpop.f32.mrf.mxu1 }
  0xbe   :  { %v412_v53 = vmul.f32 3.8918573e-05, %v1601_v49  ;;  %v401_v60 = vmul.f32 2.1237322e-06, %v1601_v49  ;;  %v1626_v7 = vadd.f32 %v298_v1, %v119_v36  ;;  %v313_v40 = vadd.f32 %v312_v29, %v120_v37 }
  0xbf   :  { %v373_v55 = vadd.f32 0.001143296, %v372_v51  ;;  %v1612_v56 = vmul.f32 0.70710677, %v1605_v50  ;;  %v362_v62 = vadd.f32 0.00028619796, %v361_v52 }
  0xc0   :  { %v413_v58 = vadd.f32 0.001143296, %v412_v53  ;;  %v402_v6 = vadd.f32 0.00028619796, %v401_v60  ;;  %v1631_v10 = vmul.f32 0.70710677, %v1621_v0 }
  0xc1   :  { %v374_v59 = vmul.f32 %v373_v55, %v1599_v47  ;;  %v439_v61 = vmul.f32 %v1612_v56, %v1612_v56  ;;  %v363_v8 = vmul.f32 %v362_v62, %v1599_v47  ;;  %v1637_v16 = vmul.f32 0.70710677, %v1626_v7 }
  0xc2   :  { %v414_v63 = vmul.f32 %v413_v58, %v1601_v49  ;;  %v403_v14 = vmul.f32 %v402_v6, %v1601_v49  ;;  %v479_v18 = vmul.f32 %v1631_v10, %v1631_v10  ;;  %v1664_v58 = vmul.f32 0.70710677, %v313_v40 }
  0xc3   :  { %v375_v2 = vadd.f32 0.014752088, %v374_v59  ;;  %v1623_v3 = vmin.f32 %v439_v61, 16.0  ;;  %v364_v17 = vadd.f32 0.0036580483, %v363_v8  ;;  %v519_v24 = vmul.f32 %v1637_v16, %v1637_v16 }
  0xc4   :  { %v415_v4 = vadd.f32 0.014752088, %v414_v63  ;;  %v404_v22 = vadd.f32 0.0036580483, %v403_v14  ;;  %v1646_v26 = vmin.f32 %v479_v18, 16.0  ;;  %v1688_v29 = vmul.f32 0.5, %v1582_v39 }
  0xc5   :  { %v376_v5 = vmul.f32 %v375_v2, %v1599_v47  ;;  %v452_v12 = vmul.f32 3.8918573e-05, %v1623_v3  ;;  %v365_v25 = vmul.f32 %v364_v17, %v1599_v47  ;;  %v441_v32 = vmul.f32 2.1237322e-06, %v1623_v3 }
  0xc6   :  { %v416_v9 = vmul.f32 %v415_v4, %v1601_v49  ;;  %v405_v30 = vmul.f32 %v404_v22, %v1601_v49  ;;  %v1653_v33 = vmin.f32 %v519_v24, 16.0  ;;  %v492_v36 = vmul.f32 3.8918573e-05, %v1646_v26 }
  0xc7   :  { %v377_v11 = vadd.f32 0.112945676, %v376_v5  ;;  %v453_v20 = vadd.f32 0.001143296, %v452_v12  ;;  %v366_v34 = vadd.f32 0.05243302, %v365_v25  ;;  %v559_v5 = vmul.f32 %v1664_v58, %v1664_v58  ;;  %v326_v25 = vpop.f32.mrf.mxu2 }
  0xc8   :  { %v417_v15 = vadd.f32 0.112945676, %v416_v9  ;;  %v406_v45 = vadd.f32 0.05243302, %v405_v30  ;;  %v442_v48 = vadd.f32 0.00028619796, %v441_v32 }
  0xc9   :  { %v378_v13 = vmul.f32 %v377_v11, %v1599_v47  ;;  %v454_v27 = vmul.f32 %v453_v20, %v1623_v3  ;;  %v521_v51 = vmul.f32 2.1237322e-06, %v1653_v33  ;;  %v367_v52 = vmul.f32 %v366_v34, %v1599_v47 }
  0xca   :  { %v418_v23 = vmul.f32 %v417_v15, %v1601_v49  ;;  %v493_v53 = vadd.f32 0.001143296, %v492_v36  ;;  %v532_v57 = vmul.f32 3.8918573e-05, %v1653_v33  ;;  %v407_v37 = vmul.f32 %v406_v45, %v1601_v49 }
  0xcb   :  { %v379_v19 = vadd.f32 0.4994258, %v378_v13  ;;  %v455_v38 = vadd.f32 0.014752088, %v454_v27  ;;  %v522_v59 = vadd.f32 0.00028619796, %v521_v51  ;;  %v443_v61 = vmul.f32 %v442_v48, %v1623_v3  ;;  %v340_v27 = vpop.f32.mrf.mxu3 }
  0xcc   :  { %v419_v31 = vadd.f32 0.4994258, %v418_v23  ;;  %v368_v63 = vadd.f32 0.18741608, %v367_v52  ;;  %v494_v1 = vmul.f32 %v493_v53, %v1646_v26  ;;  %v533_v4 = vadd.f32 0.001143296, %v532_v57 }
  0xcd   :  { %v380_v21 = vmul.f32 %v379_v19, %v1599_v47  ;;  %v456_v55 = vmul.f32 %v455_v38, %v1623_v3  ;;  %v481_v6 = vmul.f32 2.1237322e-06, %v1646_v26  ;;  %v523_v8 = vmul.f32 %v522_v59, %v1653_v33  ;;  %v1341_v59 = vld [vmem:[#allocation8 + $0x38] sm:$0xff] }
  0xce   :  { %v420_v46 = vmul.f32 %v419_v31, %v1601_v49  ;;  %v408_v11 = vadd.f32 0.18741608, %v407_v37  ;;  %v444_v12 = vadd.f32 0.0036580483, %v443_v61  ;;  %v369_v13 = vmul.f32 %v368_v63, %v1599_v47  ;;  %v1349_v37 = vld [vmem:[#allocation8 + $0x78] sm:$0xff]  ;;  %959 = vmatpush.bf16.msrb.mxu0 %v1341_v59 }
  0xcf   :  { %v1649_v28 = vadd.f32 1.0, %v380_v21  ;;  %v457_v2 = vadd.f32 0.112945676, %v456_v55  ;;  %v495_v14 = vadd.f32 0.014752088, %v494_v1  ;;  %v534_v15 = vmul.f32 %v533_v4, %v1653_v33  ;;  %973 = vmatpush.bf16.msrb.mxu1 %v1349_v37 }
  0xd0   :  { %v1667_v60 = vadd.f32 1.0, %v420_v46  ;;  %v1683_v18 = vmin.f32 %v559_v5, 16.0  ;;  %v524_v19 = vadd.f32 0.0036580483, %v523_v8  ;;  %v409_v22 = vmul.f32 %v408_v11, %v1601_v49 }
  0xd1   :  { %1378 = vrcp.f32 %v1649_v28  ;;  %v458_v17 = vmul.f32 %v457_v2, %v1623_v3  ;;  %v535_v20 = vadd.f32 0.014752088, %v534_v15  ;;  %v445_v23 = vmul.f32 %v444_v12, %v1623_v3 }
  0xd2   :  { %1380 = vrcp.f32 %v1667_v60  ;;  %v482_v24 = vadd.f32 0.00028619796, %v481_v6  ;;  %v370_v47 = vadd.f32 1.1283791, %v369_v13  ;;  %v496_v30 = vmul.f32 %v495_v14, %v1646_v26 }
  0xd3   :  { %v536_v31 = vmul.f32 %v535_v20, %v1653_v33  ;;  %v1695_v34 = vmul.f32 0.5, %v1586_v41  ;;  %v459_v36 = vadd.f32 0.4994258, %v458_v17  ;;  %v1698_v49 = vmul.f32 0.5, %v1626_v7  ;;  %v1340_v17 = vld [vmem:[#allocation8 + $0x30] sm:$0xff]  ;;  %v1363_v20 = vld [vmem:[#allocation8 + $0xe8] sm:$0xff] }
  0xd4   :  { %v561_v38 = vmul.f32 2.1237322e-06, %v1683_v18  ;;  %v525_v45 = vmul.f32 %v524_v19, %v1653_v33  ;;  %v1702_v39 = vmul.f32 0.5, %v313_v40  ;;  %v1706_v46 = vadd.f32 %v326_v25, %v121_v44  ;;  %v1348_v19 = vld [vmem:[#allocation8 + $0x70] sm:$0xff]  ;;  %v1365_v25 = vld [vmem:[#allocation8 + $0xf8] sm:$0xff]  ;;  %960 = vmatpush.bf16.msrb.mxu0 %v1340_v17 }
  0xd5   :  { %v1710_v48 = vadd.f32 %v340_v27, %v122_v54  ;;  %v410_v51 = vadd.f32 1.1283791, %v409_v22  ;;  %v446_v52 = vadd.f32 0.05243302, %v445_v23  ;;  %v483_v7 = vmul.f32 %v482_v24, %v1646_v26  ;;  %v1357_v24 = vld [vmem:[#allocation8 + $0xb8] sm:$0xff]  ;;  %974 = vmatpush.bf16.msrb.mxu1 %v1348_v19  ;;  %1001 = vmatpush.bf16.msrb.mxu3 %v1365_v25  ;;  %v1355_v19 = vld [vmem:[#allocation8 + $0xa8] sm:$0xff] }
  0xd6   :  { %v1715_v53 = vmul.f32 %v370_v47, %v1589_v42  ;;  %v497_v55 = vadd.f32 0.112945676, %v496_v30  ;;  %v537_v57 = vadd.f32 0.112945676, %v536_v31  ;;  %vm387_vm0 = vweird.f32 %v1649_v28  ;;  %987 = vmatpush.bf16.msrb.mxu2 %v1357_v24 }
  0xd7   :  { %v1670_v62 = vpop.eup %1378  ;;  %v391_v35 = vand.u32 2147483647, %v1649_v28  ;;  %v460_v44 = vmul.f32 %v459_v36, %v1623_v3  ;;  %v562_v54 = vadd.f32 0.00028619796, %v561_v38  ;;  %v393_v61 = vand.u32 2147483648, %v1649_v28 }
  0xd8   :  { %v383_v9 = vmul.f32 %v1670_v62, %v1649_v28  ;;  %v1692_v32 = vpop.eup %1380  ;;  %v526_v63 = vadd.f32 0.05243302, %v525_v45  ;;  %v538_v42 = vmul.f32 %v537_v57, %v1653_v33  ;;  %v572_v1 = vmul.f32 3.8918573e-05, %v1683_v18  ;;  %v1356_v57 = vld [vmem:[#allocation8 + $0xb0] sm:$0xff] }
  0xd9   :  { %v423_v40 = vmul.f32 %v1692_v32, %v1667_v60  ;;  %vm388_vm1 = vweird.f32 %v1670_v62  ;;  %v447_v4 = vmul.f32 %v446_v52, %v1623_v3  ;;  %v1729_v5 = vmul.f32 0.70710677, %v1706_v46  ;;  %v1347_v52 = vld [vmem:[#allocation8 + $0x68] sm:$0xff] }
  0xda   :  { %v384_v21 = vsub.f32 1.0, %v383_v9  ;;  %v498_v8 = vmul.f32 %v497_v55, %v1646_v26  ;;  %v539_v9 = vadd.f32 0.4994258, %v538_v42  ;;  %v573_v11 = vadd.f32 0.001143296, %v572_v1  ;;  %vm1743_vm2 = vmor %vm387_vm0, %vm388_vm1  ;;  %975 = vmatpush.bf16.msrb.mxu1 %v1347_v52  ;;  %988 = vmatpush.bf16.msrb.mxu2 %v1356_v57 }
  0xdb   :  { %v424_v6 = vsub.f32 1.0, %v423_v40  ;;  %v1733_v12 = vmul.f32 %v410_v51, %v1592_v43  ;;  %v431_v13 = vand.u32 2147483647, %v1667_v60  ;;  %v1736_v14 = vadd.f32 1.0, %v460_v44  ;;  %v1339_v51 = vld [vmem:[#allocation8 + $0x28] sm:$0xff]  ;;  %v1364_v44 = vld [vmem:[#allocation8 + $0xf0] sm:$0xff] }
  0xdc   :  { %v385_v41 = vmul.f32 %v1670_v62, %v384_v21  ;;  %v563_v15 = vmul.f32 %v562_v54, %v1683_v18  ;;  %v394_v21 = vor.u32 1.1754944e-38, %v393_v61  ;;  %v527_v43 = vmul.f32 %v526_v63, %v1653_v33  ;;  %961 = vmatpush.bf16.msrb.mxu0 %v1339_v51  ;;  %1002 = vmatpush.bf16.msrb.mxu3 %v1364_v44 }
  0xdd   :  { %v540_v22 = vmul.f32 %v539_v9, %v1653_v33  ;;  %v574_v23 = vmul.f32 %v573_v11, %v1683_v18  ;;  %v448_v47 = vadd.f32 0.18741608, %v447_v4  ;;  %v484_v30 = vadd.f32 0.0036580483, %v483_v7 }
  0xde   :  { %v386_v2 = vadd.f32 %v1670_v62, %v385_v41  ;;  %v599_v28 = vmul.f32 %v1729_v5, %v1729_v5  ;;  %v425_v31 = vmul.f32 %v1692_v32, %v424_v6  ;;  %v499_v36 = vadd.f32 0.4994258, %v498_v8  ;;  %v1338_v6 = vld [vmem:[#allocation8 + $0x20] sm:$0xff]  ;;  %989 = vmatpush.bf16.msrb.mxu2 %v1355_v19 }
  0xdf   :  { %v1756_v38 = vadd.f32 1.0, %v540_v22  ;;  %v575_v45 = vadd.f32 0.014752088, %v574_v23  ;;  %vm392_vm3 = vcmp.eq.f32.partialorder %v391_v35, 8.507059e+37  ;;  %1382 = vrcp.f32 %v1736_v14  ;;  %v1346_v8 = vld [vmem:[#allocation8 + $0x60] sm:$0xff] }
  0xe0   :  { %v390_v27 = vsel %vm1743_vm2, %v1670_v62, %v386_v2  ;;  %v564_v41 = vadd.f32 0.0036580483, %v563_v15  ;;  %v1759_v62 = vmin.f32 %v599_v28, 16.0  ;;  %v528_v40 = vadd.f32 0.18741608, %v527_v43  ;;  %962 = vmatpush.bf16.msrb.mxu0 %v1338_v6  ;;  %976 = vmatpush.bf16.msrb.mxu1 %v1346_v8 }
  0xe1   :  { %v395_v7 = vsel %vm392_vm3, %v394_v21, %v390_v27  ;;  %1384 = vrcp.f32 %v1756_v38  ;;  %v1763_v55 = vmul.f32 0.70710677, %v1710_v48  ;;  %v433_v54 = vand.u32 2147483648, %v1667_v60  ;;  %1003 = vmatpush.bf16.msrb.mxu3 %v1363_v20  ;;  %v1361_v20 = vld [vmem:[#allocation8 + $0xd8] sm:$0xff] }
  0xe2   :  { %v449_v35 = vmul.f32 %v448_v47, %v1623_v3  ;;  %v485_v59 = vmul.f32 %v484_v30, %v1646_v26  ;;  %v576_v37 = vmul.f32 %v575_v45, %v1683_v18  ;;  %v1770_v61 = vadd.f32 %v1692_v32, %v425_v31  ;;  %v1337_v47 = vld [vmem:[#allocation8 + $0x18] sm:$0xff] }
  0xe3   :  { %vm428_vm4 = vweird.f32 %v1692_v32  ;;  %v601_v63 = vmul.f32 2.1237322e-06, %v1759_v62  ;;  %v612_v42 = vmul.f32 3.8918573e-05, %v1759_v62  ;;  %v1776_v1 = vmul.f32 %v395_v7, %v1715_v53  ;;  %v1345_v30 = vld [vmem:[#allocation8 + $0x58] sm:$0xff] }
  0xe4   :  { %v500_v3 = vmul.f32 %v499_v36, %v1646_v26  ;;  %v565_v2 = vmul.f32 %v564_v41, %v1683_v18  ;;  %v577_v4 = vadd.f32 0.112945676, %v576_v37  ;;  %v529_v9 = vmul.f32 %v528_v40, %v1653_v33  ;;  %963 = vmatpush.bf16.msrb.mxu0 %v1337_v47  ;;  %977 = vmatpush.bf16.msrb.mxu1 %v1345_v30  ;;  %v1335_v47 = vld [vmem:[#allocation8 + $0x8] sm:$0xff] }
  0xe5   :  { %v602_v11 = vadd.f32 0.00028619796, %v601_v63  ;;  %v613_v15 = vadd.f32 0.001143296, %v612_v42  ;;  %v639_v17 = vmul.f32 %v1763_v55, %v1763_v55  ;;  %v1783_v21 = vpop.eup %1382  ;;  %vm427_vm5 = vweird.f32 %v1667_v60  ;;  %v1362_v60 = vld [vmem:[#allocation8 + $0xe0] sm:$0xff]  ;;  %v1336_v42 = vld [vmem:[#allocation8 + $0x10] sm:$0xff] }
  0xe6   :  { %v1786_v53 = vor.u32 1.1754944e-38, %v433_v54  ;;  %v1788_v43 = vadd.f32 0.05243302, %v485_v59  ;;  %v578_v22 = vmul.f32 %v577_v4, %v1683_v18  ;;  %v1793_v23 = vadd.f32 1.1283791, %v449_v35  ;;  %vm1804_vm6 = vmor %vm427_vm5, %vm428_vm4  ;;  %1004 = vmatpush.bf16.msrb.mxu3 %v1362_v60  ;;  %v1343_v30 = vld [vmem:[#allocation8 + $0x48] sm:$0xff] }
  0xe7   :  { %v1791_v33 = vpop.eup %1384  ;;  %v603_v24 = vmul.f32 %v602_v11, %v1759_v62  ;;  %v614_v25 = vmul.f32 %v613_v15, %v1759_v62  ;;  %v1797_v27 = vmin.f32 %v639_v17, 16.0  ;;  %v1166_v28 = vclamps-f32 %v1776_v1, 1.0  ;;  %v1344_v1 = vld [vmem:[#allocation8 + $0x50] sm:$0xff]  ;;  %v1353_v11 = vld [vmem:[#allocation8 + $0x98] sm:$0xff] }
  0xe8   :  { %v1808_v36 = vadd.f32 1.0, %v500_v3  ;;  %v543_v45 = vmul.f32 %v1791_v33, %v1756_v38  ;;  %v566_v41 = vadd.f32 0.05243302, %v565_v2  ;;  %v430_v51 = vsel %vm1804_vm6, %v1692_v32, %v1770_v61  ;;  %v1354_v32 = vld [vmem:[#allocation8 + $0xa0] sm:$0xff]  ;;  %964 = vmatpush.bf16.msrb.mxu0 %v1336_v42  ;;  %978 = vmatpush.bf16.msrb.mxu1 %v1344_v1 }
  0xe9   :  { %vm1818_vm7 = vcmp.eq.f32.partialorder %v431_v13, 8.507059e+37  ;;  %v530_v7 = vadd.f32 1.1283791, %v529_v9  ;;  %v579_v40 = vadd.f32 0.4994258, %v578_v22  ;;  %v1824_v44 = vmul.f32 %v1783_v21, %v1736_v14  ;;  %990 = vmatpush.bf16.msrb.mxu2 %v1354_v32 }
  0xea   :  { %v615_v57 = vadd.f32 0.014752088, %v614_v25  ;;  %v544_v54 = vsub.f32 1.0, %v543_v45  ;;  %v553_v35 = vand.u32 2147483648, %v1756_v38  ;;  %v641_v59 = vmul.f32 2.1237322e-06, %v1797_v27  ;;  %1005 = vmatpush.bf16.msrb.mxu3 %v1361_v20 }
  0xeb   :  { %v580_v13 = vmul.f32 %v579_v40, %v1683_v18  ;;  %v604_v37 = vadd.f32 0.0036580483, %v603_v24  ;;  %v652_v63 = vmul.f32 3.8918573e-05, %v1797_v27  ;;  %vm548_vm8 = vweird.f32 %v1791_v33 }
  0xec   :  { %v616_v61 = vmul.f32 %v615_v57, %v1759_v62  ;;  %v545_v3 = vmul.f32 %v1791_v33, %v544_v54  ;;  %v551_v2 = vand.u32 2147483647, %v1756_v38  ;;  %v567_v4 = vmul.f32 %v566_v41, %v1683_v18  ;;  %v1352_v57 = vld [vmem:[#allocation8 + $0x90] sm:$0xff]  ;;  %965 = vmatpush.bf16.msrb.mxu0 %v1335_v47  ;;  %979 = vmatpush.bf16.msrb.mxu1 %v1343_v30 }
  0xed   :  { %1386 = vrcp.f32 %v1808_v36  ;;  %v1836_v6 = vadd.f32 1.0, %v580_v13  ;;  %v642_v9 = vadd.f32 0.00028619796, %v641_v59  ;;  %v464_v15 = vsub.f32 1.0, %v1824_v44  ;;  %991 = vmatpush.bf16.msrb.mxu2 %v1353_v11  ;;  %v1360_v44 = vld [vmem:[#allocation8 + $0xd0] sm:$0xff] }
  0xee   :  { %v617_v8 = vadd.f32 0.112945676, %v616_v61  ;;  %v546_v17 = vadd.f32 %v1791_v33, %v545_v3  ;;  %vm547_vm9 = vweird.f32 %v1756_v38  ;;  %v653_v19 = vadd.f32 0.001143296, %v652_v63  ;;  %v1334_v61 = vld [vmem:[#allocation8] sm:$0xff]  ;;  %1006 = vmatpush.bf16.msrb.mxu3 %v1360_v44 }
  0xef   :  { %v531_v22 = vmul.f32 %v530_v7, %v1637_v16  ;;  %vm549_vm10 = vmor %vm547_vm9, %vm548_vm8  ;;  %v554_v24 = vor.u32 1.1754944e-38, %v553_v35  ;;  %1388 = vrcp.f32 %v1836_v6  ;;  %v605_v25 = vmul.f32 %v604_v37, %v1759_v62  ;;  %v1342_v63 = vld [vmem:[#allocation8 + $0x40] sm:$0xff] }
  0xf0   :  { %v550_v31 = vsel %vm549_vm10, %v1791_v33, %v546_v17  ;;  %vm552_vm11 = vcmp.eq.f32.partialorder %v551_v2, 8.507059e+37  ;;  %v568_v38 = vadd.f32 0.18741608, %v567_v4  ;;  %v618_v45 = vmul.f32 %v617_v8, %v1759_v62  ;;  %v1351_v4 = vld [vmem:[#allocation8 + $0x88] sm:$0xff]  ;;  %966 = vmatpush.bf16.msrb.mxu0 %v1334_v61  ;;  %980 = vmatpush.bf16.msrb.mxu1 %v1342_v63 }
  0xf1   :  { %v471_v16 = vand.u32 2147483647, %v1736_v14  ;;  %v555_v41 = vsel %vm552_vm11, %v554_v24, %v550_v31  ;;  %v643_v7 = vmul.f32 %v642_v9, %v1797_v27  ;;  %v654_v40 = vmul.f32 %v653_v19, %v1797_v27  ;;  %992 = vmatpush.bf16.msrb.mxu2 %v1352_v57  ;;  %v1359_v8 = vld [vmem:[#allocation8 + $0xc8] sm:$0xff]  ;;  %v1350_v31 = vld [vmem:[#allocation8 + $0x80] sm:$0xff] }
  0xf2   :  { %v679_v54 = vadd.f32 1.0, %v1166_v28  ;;  %v435_v33 = vsel %vm1818_vm7, %v1786_v53, %v430_v51  ;;  %v556_v35 = vmul.f32 %v555_v41, %v531_v22  ;;  %v619_v59 = vadd.f32 0.4994258, %v618_v45  ;;  %1007 = vmatpush.bf16.msrb.mxu3 %v1359_v8 }
  0xf3   :  { %v1854_v32 = vpop.eup %1386  ;;  %vm467_vm12 = vweird.f32 %v1736_v14  ;;  %v487_v60 = vmul.f32 %v1788_v43, %v1646_v26  ;;  %v606_v13 = vadd.f32 0.05243302, %v605_v25  ;;  %v655_v37 = vadd.f32 0.014752088, %v654_v40 }
  0xf4   :  { %v465_v28 = vmul.f32 %v1783_v21, %v464_v15  ;;  %v1170_v42 = vclamps-f32 %v556_v35, 1.0  ;;  %v569_v53 = vmul.f32 %v568_v38, %v1683_v18  ;;  %v620_v51 = vmul.f32 %v619_v59, %v1759_v62  ;;  %v1358_v38 = vld [vmem:[#allocation8 + $0xc0] sm:$0xff] }
  0xf5   :  { %v1389_v52 = vpop.eup %1388  ;;  %v436_v1 = vmul.f32 %v435_v33, %v1733_v12  ;;  %v473_v3 = vand.u32 2147483648, %v1736_v14  ;;  %v644_v2 = vadd.f32 0.0036580483, %v643_v7  ;;  %v656_v43 = vmul.f32 %v655_v37, %v1797_v27  ;;  %993 = vmatpush.bf16.msrb.mxu2 %v1351_v4 }
  0xf6   :  { %v687_v9 = vmul.f32 %v679_v54, %v1688_v29  ;;  %vm468_vm13 = vweird.f32 %v1783_v21  ;;  %v683_v11 = vadd.f32 1.0, %v1170_v42  ;;  %v583_v18 = vmul.f32 %v1389_v52, %v1836_v6  ;;  %1008 = vmatpush.bf16.msrb.mxu3 %v1358_v38 }
  0xf7   :  { %v503_v15 = vmul.f32 %v1854_v32, %v1808_v36  ;;  %v607_v12 = vmul.f32 %v606_v13, %v1759_v62  ;;  %v1871_v17 = vadd.f32 1.0, %v620_v51  ;;  %v657_v19 = vadd.f32 0.112945676, %v656_v43  ;;  %vm1884_vm15 = vmor %vm467_vm12, %vm468_vm13 }
  0xf8   :  { %v466_v20 = vadd.f32 %v1783_v21, %v465_v28  ;;  %v691_v22 = vmul.f32 %v683_v11, %v1698_v49  ;;  %v570_v29 = vadd.f32 1.1283791, %v569_v53  ;;  %v584_v24 = vsub.f32 1.0, %v583_v18 }
  0xf9   :  { %v591_v25 = vand.u32 2147483647, %v1836_v6  ;;  %v593_v47 = vand.u32 2147483648, %v1836_v6  ;;  %1390 = vrcp.f32 %v1871_v17  ;;  %v645_v30 = vmul.f32 %v644_v2, %v1797_v27  ;;  %994 = vmatpush.bf16.msrb.mxu2 %v1350_v31 }
  0xfa   :  { %v585_v45 = vmul.f32 %v1389_v52, %v584_v24  ;;  %vm588_vm14 = vweird.f32 %v1389_v52  ;;  %v658_v41 = vmul.f32 %v657_v19, %v1797_v27  ;;  %v695_v7 = vpack.c.bf16 %v691_v22, %v687_v9 }
  0xfb   :  { %vm1888_vm0 = vcmp.eq.f32.partialorder %v471_v16, 8.507059e+37  ;;  %v488_v57 = vadd.f32 0.18741608, %v487_v60  ;;  %v504_v44 = vsub.f32 1.0, %v503_v15  ;;  %v608_v54 = vadd.f32 0.18741608, %v607_v12 }
  0xfc   :  { %v470_v33 = vsel %vm1884_vm15, %v1783_v21, %v466_v20  ;;  %v586_v35 = vadd.f32 %v1389_v52, %v585_v45  ;;  %vm587_vm1 = vweird.f32 %v1836_v6  ;;  %v659_v59 = vadd.f32 0.4994258, %v658_v41  ;;  %967 = vmatmul.bf16.vlgmr.msrb.gmra.mxu0 %v695_v7 }
  0xfd   :  { %v1167_v14 = vclamps-f32 %v436_v1, 1.0  ;;  %v474_v13 = vor.u32 1.1754944e-38, %v473_v3  ;;  %vm589_vm2 = vmor %vm587_vm1, %vm588_vm14  ;;  %v594_v16 = vor.u32 1.1754944e-38, %v593_v47  ;;  %v646_v37 = vadd.f32 0.05243302, %v645_v30 }
  0xfe   :  { %v571_v60 = vmul.f32 %v570_v29, %v1664_v58  ;;  %v590_v61 = vsel %vm589_vm2, %v1389_v52, %v586_v35  ;;  %vm592_vm3 = vcmp.eq.f32.partialorder %v591_v25, 8.507059e+37  ;;  %v660_v63 = vmul.f32 %v659_v59, %v1797_v27 }
  0xff   :  { %v1391_v21 = vpop.eup %1390  ;;  %v475_v6 = vsel %vm1888_vm0, %v474_v13, %v470_v33  ;;  %v505_v28 = vmul.f32 %v1854_v32, %v504_v44  ;;  %v595_v42 = vsel %vm592_vm3, %v594_v16, %v590_v61  ;;  %v609_v53 = vmul.f32 %v608_v54, %v1759_v62 }
 0x100   :  { %v451_v51 = vmul.f32 %v1793_v23, %v1612_v56  ;;  %v489_v1 = vmul.f32 %v488_v57, %v1646_v26  ;;  %v596_v3 = vmul.f32 %v595_v42, %v571_v60  ;;  %v623_v58 = vmul.f32 %v1391_v21, %v1871_v17 }
 0x101   :  { %v680_v52 = vadd.f32 1.0, %v1167_v14  ;;  %v513_v2 = vand.u32 2147483648, %v1808_v36  ;;  %v647_v43 = vmul.f32 %v646_v37, %v1797_v27  ;;  %v661_v4 = vadd.f32 1.0, %v660_v63 }
 0x102   :  { %v476_v8 = vmul.f32 %v475_v6, %v451_v51  ;;  %vm508_vm4 = vweird.f32 %v1854_v32  ;;  %v1171_v9 = vclamps-f32 %v596_v3, 1.0  ;;  %v624_v11 = vsub.f32 1.0, %v623_v58 }
 0x103   :  { %v506_v62 = vadd.f32 %v1854_v32, %v505_v28  ;;  %v610_v18 = vadd.f32 1.1283791, %v609_v53  ;;  %v633_v56 = vand.u32 2147483648, %v1871_v17  ;;  %1392 = vrcp.f32 %v661_v4 }
 0x104   :  { %v684_v26 = vadd.f32 1.0, %v1171_v9  ;;  %v625_v23 = vmul.f32 %v1391_v21, %v624_v11  ;;  %vm628_vm5 = vweird.f32 %v1391_v21  ;;  %v631_v15 = vand.u32 2147483647, %v1871_v17 }
 0x105   :  { %v490_v12 = vadd.f32 1.1283791, %v489_v1  ;;  %vm507_vm6 = vweird.f32 %v1808_v36  ;;  %v511_v19 = vand.u32 2147483647, %v1808_v36  ;;  %v648_v20 = vadd.f32 0.18741608, %v647_v43 }
 0x106   :  { %v688_v22 = vmul.f32 %v680_v52, %v1695_v34  ;;  %vm1918_vm7 = vmor %vm507_vm6, %vm508_vm4  ;;  %v692_v24 = vmul.f32 %v684_v26, %v1702_v39  ;;  %v626_v25 = vadd.f32 %v1391_v21, %v625_v23  ;;  %vm627_vm8 = vweird.f32 %v1871_v17 }
 0x107   :  { %v1168_v47 = vclamps-f32 %v476_v8, 1.0  ;;  %v510_v30 = vsel %vm1918_vm7, %v1854_v32, %v506_v62  ;;  %v514_v36 = vor.u32 1.1754944e-38, %v513_v2  ;;  %vm629_vm9 = vmor %vm627_vm8, %vm628_vm5  ;;  %v634_v31 = vor.u32 1.1754944e-38, %v633_v56 }
 0x108   :  { %v611_v34 = vmul.f32 %v610_v18, %v1729_v5  ;;  %v630_v38 = vsel %vm629_vm9, %v1391_v21, %v626_v25  ;;  %vm632_vm10 = vcmp.eq.f32.partialorder %v631_v15, 8.507059e+37  ;;  %v696_v45 = vpack.c.bf16 %v692_v24, %v688_v22 }
 0x109   :  { %v1393_v41 = vpop.eup %1392  ;;  %vm512_vm11 = vcmp.eq.f32.partialorder %v511_v19, 8.507059e+37  ;;  %v635_v7 = vsel %vm632_vm10, %v634_v31, %v630_v38  ;;  %v649_v39 = vmul.f32 %v648_v20, %v1797_v27  ;;  %v491_v57 = vmul.f32 %v490_v12, %v1631_v10 }
 0x10a   :  { %v515_v49 = vsel %vm512_vm11, %v514_v36, %v510_v30  ;;  %v636_v17 = vmul.f32 %v635_v7, %v611_v34  ;;  %v663_v40 = vmul.f32 %v1393_v41, %v661_v4  ;;  %981 = vmatmul.bf16.vlgmr.msrb.gmra.mxu1 %v696_v45  ;;  %v345_v32 = vmul.f32 0.5, %v1605_v50 }
 0x10b   :  { %v681_v44 = vadd.f32 1.0, %v1168_v47  ;;  %v516_v5 = vmul.f32 %v515_v49, %v491_v57  ;;  %v349_v35 = vmul.f32 0.5, %v1706_v46  ;;  %v650_v59 = vadd.f32 1.1283791, %v649_v39 }
 0x10c   :  { %v1172_v54 = vclamps-f32 %v636_v17, 1.0  ;;  %v664_v33 = vsub.f32 1.0, %v663_v40  ;;  %v673_v14 = vand.u32 2147483648, %v661_v4  ;;  %vm668_vm12 = vweird.f32 %v1393_v41 }
 0x10d   :  { %v671_v27 = vand.u32 2147483647, %v661_v4  ;;  %v689_v37 = vmul.f32 %v681_v44, %v345_v32  ;;  %vm667_vm13 = vweird.f32 %v661_v4  ;;  %v1169_v63 = vclamps-f32 %v516_v5, 1.0 }
 0x10e   :  { %v685_v13 = vadd.f32 1.0, %v1172_v54  ;;  %v665_v16 = vmul.f32 %v1393_v41, %v664_v33  ;;  %vm669_vm14 = vmor %vm667_vm13, %vm668_vm12  ;;  %v674_v10 = vor.u32 1.1754944e-38, %v673_v14  ;;  %v651_v50 = vmul.f32 %v650_v59, %v1763_v55  ;;  %v1377_v55 = vld [vmem:[%s1948_s4] ss:$0 sm:$0xff]  ;;  %s1023_s4 = sshll.u32 %s1949_s5, 4  ;;  %s1024_s4 = int_to_ptr.hbm [resolvable:$true] %s1023_s4 }
 0x10f   :  { %vm672_vm15 = vcmp.eq.f32.partialorder %v671_v27, 8.507059e+37  ;;  %v682_v42 = vadd.f32 1.0, %v1169_v63  ;;  %v346_v51 = vmul.f32 0.5, %v1621_v0  ;;  %v350_v1 = vmul.f32 0.5, %v1710_v48 }
 0x110   :  { %v693_v60 = vmul.f32 %v685_v13, %v349_v35  ;;  %v666_v61 = vadd.f32 %v1393_v41, %v665_v16 }
 0x111   :  { %v690_v58 = vmul.f32 %v682_v42, %v346_v51 }
 0x112   :  { %v670_v21 = vsel %vm669_vm14, %v1393_v41, %v666_v61  ;;  %v697_v6 = vpack.c.bf16 %v693_v60, %v689_v37 }
 0x113   :  { %v675_v28 = vsel %vm672_vm15, %v674_v10, %v670_v21 }
 0x114   :  { %v676_v46 = vmul.f32 %v675_v28, %v651_v50  ;;  %995 = vmatmul.bf16.vlgmr.msrb.gmra.mxu2 %v697_v6 }
 0x116   :  { %v1173_v53 = vclamps-f32 %v676_v46, 1.0 }
 0x118   :  { %v686_v3 = vadd.f32 1.0, %v1173_v53 }
 0x11a   :  { %v694_v52 = vmul.f32 %v686_v3, %v350_v1 }
 0x11c   :  { %v698_v2 = vpack.c.bf16 %v694_v52, %v690_v58 }
 0x11e   :  { %1009 = vmatmul.bf16.vlgmr.msrb.gmra.mxu3 %v698_v2 }
 0x179   :  { %v968_v43 = vpop.f32.mrf.mxu0 }
 0x17a   :  { %v969_v4 = vadd.f32 %v1377_v55, %v968_v43 }
 0x181   :  { %v970_v62 = vpop.f32.mrf.mxu0 }
 0x182   :  { %v971_v56 = vadd.f32 %v1377_v55, %v970_v62 }
 0x187   :  { %v982_v8 = vpop.f32.mrf.mxu1 }
 0x188   :  { %v983_v11 = vadd.f32 %v982_v8, %v969_v4 }
 0x18f   :  { %v984_v48 = vpop.f32.mrf.mxu1 }
 0x190   :  { %v985_v15 = vadd.f32 %v984_v48, %v971_v56 }
 0x197   :  { %v996_v9 = vpop.f32.mrf.mxu2 }
 0x198   :  { %v997_v18 = vadd.f32 %v996_v9, %v983_v11 }
 0x19f   :  { %v998_v23 = vpop.f32.mrf.mxu2 }
 0x1a0   :  { %v999_v12 = vadd.f32 %v998_v23, %v985_v15 }
 0x1a1   :  { %v1010_v0 = vpop.f32.mrf.mxu3 }
 0x1a2   :  { %v1011_v26 = vadd.f32 %v1010_v0, %v997_v18 }
 0x1a4   :  { %1015 = vst [vmem:[#allocation10] sm:$0xff] %v1011_v26 }
 0x1a9   :  { %v1012_v19 = vpop.f32.mrf.mxu3 }
 0x1aa   :  { %v1013_v20 = vadd.f32 %v1012_v19, %v999_v12 }
 0x1ac   :  { %1016 = vst [vmem:[#allocation10 + $0x8] sm:$0xff] %v1013_v20 }
 0x1ad   :  { %1029 = dma.vmem_to_hbm [thread:$0]  %s1022_s18, 256, %s1024_s4, [#allocation4], %s1526_s30, %s1526_s30, %s1527_s6  }
 0x1ae   :  { %1520 = dma.done.wait [#allocation4], 256  }
 0x1af   :  { %1521 = vsyncadd [#allocation4], 4294967040 }
 0x1b0   :  { %1034 = vsyncpa [#allocation3], 1 }
 0x1b1   :  { %1035 = vsyncpa [#allocation6], 1 }
 0x1b2   :  { %1036 = vsyncpa [#allocation9], 1 }
 0x1b3   :  { %1037 = vsyncpa [#allocation4], 1 }

</bundles_post_ra>
